<compile_context>
chip_gen: v5e
topology: v5e:2x2
jax: 0.10.0
libtpu: 0.0.40
codegen_flags: <defaults>
</compile_context>

<pallas_src>
import functools

import jax
import jax.numpy as jnp
import numpy as np
from jax.experimental import pallas as pl
from jax.experimental.pallas import tpu as pltpu

_LANES = 128


def _gray_loss_kernel(x_ref, out_ref, acc_ref, *, n_valid):
    """Accumulate sum(|x - 0.5|) per row-tile; emit 1/mean on the last step."""
    step = pl.program_id(0)

    @pl.when(step == 0)
    def _():
        acc_ref[0] = jnp.float32(0.0)

    # VPU abs/sub + full reduce of a lane-dense (tile_rows, 128) block.
    acc_ref[0] += jnp.sum(jnp.abs(x_ref[...] - jnp.float32(0.5)))

    @pl.when(step == pl.num_programs(0) - 1)
    def _():
        # 1 / mean(|x - 0.5|) over the *valid* (unpadded) element count.
        out_ref[0, 0] = jnp.float32(n_valid) / acc_ref[0]


@jax.jit
def gray_loss(x):
    """Pallas implementation of GrayLoss.forward for any input shape."""
    n = x.size
    rows = pl.cdiv(n, _LANES)
    # Biggest convenient (8,128)-aligned row tile; cap at 512 rows (256 KiB/block,
    # double-buffered 512 KiB) so large images still pipeline within VMEM limits.
    tile_rows = min(512, ((rows + 7) // 8) * 8)
    padded_rows = pl.cdiv(rows, tile_rows) * tile_rows
    padded = padded_rows * _LANES

    flat = x.reshape(-1).astype(jnp.float32)
    if padded > n:
        # Pad with 0.5 so padding contributes 0 to sum(|x - 0.5|).
        flat = jnp.concatenate(
            [flat, jnp.full((padded - n,), 0.5, dtype=jnp.float32)])
    x2d = flat.reshape(padded_rows, _LANES)

    grid = (padded_rows // tile_rows,)
    out = pl.pallas_call(
        functools.partial(_gray_loss_kernel, n_valid=n),
        out_shape=jax.ShapeDtypeStruct((1, 1), jnp.float32),
        grid_spec=pltpu.PrefetchScalarGridSpec(
            num_scalar_prefetch=0,
            grid=grid,
            in_specs=[pl.BlockSpec((tile_rows, _LANES), lambda i: (i, 0))],
            out_specs=pl.BlockSpec(
                (1, 1), lambda i: (0, 0),
                memory_space=pltpu.MemorySpace.SMEM),
            scratch_shapes=[pltpu.SMEM((1,), jnp.float32)],
        ),
        compiler_params=pltpu.CompilerParams(
            dimension_semantics=("arbitrary",)),
    )(x2d)
    return out[0, 0]


def gray_loss_ref(x):
    """Pure-JAX reference mirroring the PyTorch module."""
    return 1.0 / jnp.mean(jnp.abs(x.astype(jnp.float32) - 0.5))


if __name__ == "__main__":
    key = jax.random.PRNGKey(0)
    k1, k2 = jax.random.split(key)

    # Small NCHW input consistent with an image-loss module.
    x = jax.random.uniform(k1, (2, 4, 16, 16), dtype=jnp.float32)
    out = jax.block_until_ready(gray_loss(x))
    ref = gray_loss_ref(x)
    np.testing.assert_allclose(np.asarray(out), np.asarray(ref),
                               rtol=1e-4, atol=1e-6)

    # Non-tile-aligned size to exercise the 0.5-padding path.
    x2 = jax.random.uniform(k2, (2, 3, 11, 13), dtype=jnp.float32)
    out2 = jax.block_until_ready(gray_loss(x2))
    ref2 = gray_loss_ref(x2)
    np.testing.assert_allclose(np.asarray(out2), np.asarray(ref2),
                               rtol=1e-4, atol=1e-6)

    print("KERNEL_OK")
</pallas_src>

<mosaic_0001>
module attributes {stable_mosaic.version = 11 : i64} {
  func.func @_gray_loss_kernel(%arg0: i32, %arg1: memref<16x128xf32, #tpu.memory_space<vmem>>, %arg2: memref<1x1xf32, #tpu.memory_space<smem>>, %arg3: memref<1xf32, #tpu.memory_space<smem>>) attributes {dimension_semantics = [#tpu.dimension_semantics<arbitrary>], iteration_bounds = array<i64: 1>, scalar_prefetch = 0 : i64, scratch_operands = 1 : i64, tpu.core_type = #tpu.core_type<tc>, window_params = [{transform_indices = @transform_0, window_bounds = array<i64: 16, 128>}, {transform_indices = @transform_1, window_bounds = array<i64: 1, 1>}]} {
    %c0_i32 = arith.constant 0 : i32
    %0 = arith.cmpi eq, %arg0, %c0_i32 : i32
    %1 = arith.extui %0 : i1 to i32
    %c0_i32_0 = arith.constant 0 : i32
    %2 = arith.cmpi ne, %1, %c0_i32_0 : i32
    scf.if %2 {
      %cst_7 = arith.constant 0.000000e+00 : f32
      %c0_8 = arith.constant 0 : index
      %17 = memref.load %arg3[%c0_8] : memref<1xf32, #tpu.memory_space<smem>>
      memref.store %cst_7, %arg3[%c0_8] : memref<1xf32, #tpu.memory_space<smem>>
    } else {
    }
    %c0 = arith.constant 0 : index
    %3 = memref.load %arg3[%c0] : memref<1xf32, #tpu.memory_space<smem>>
    %c0_1 = arith.constant 0 : index
    %c0_2 = arith.constant 0 : index
    %4 = vector.load %arg1[%c0_1, %c0_2] : memref<16x128xf32, #tpu.memory_space<vmem>>, vector<16x128xf32>
    %cst = arith.constant 5.000000e-01 : f32
    %5 = vector.broadcast %cst : f32 to vector<16x128xf32>
    %6 = arith.subf %4, %5 : vector<16x128xf32>
    %7 = math.absf %6 : vector<16x128xf32>
    %8 = vector.shape_cast %7 : vector<16x128xf32> to vector<1x16x128xf32>
    %cst_3 = arith.constant dense<0.000000e+00> : vector<1xf32>
    %9 = vector.multi_reduction <add>, %8, %cst_3 [1, 2] : vector<1x16x128xf32> to vector<1xf32>
    %10 = vector.shape_cast %9 : vector<1xf32> to vector<1x1x1xf32>
    %11 = vector.extract %10[0, 0, 0] : f32 from vector<1x1x1xf32>
    %12 = arith.addf %3, %11 : f32
    %c0_4 = arith.constant 0 : index
    %13 = memref.load %arg3[%c0_4] : memref<1xf32, #tpu.memory_space<smem>>
    memref.store %12, %arg3[%c0_4] : memref<1xf32, #tpu.memory_space<smem>>
    %c0_i32_5 = arith.constant 0 : i32
    %14 = arith.cmpi eq, %arg0, %c0_i32_5 : i32
    %15 = arith.extui %14 : i1 to i32
    %c0_i32_6 = arith.constant 0 : i32
    %16 = arith.cmpi ne, %15, %c0_i32_6 : i32
    scf.if %16 {
      %c0_7 = arith.constant 0 : index
      %17 = memref.load %arg3[%c0_7] : memref<1xf32, #tpu.memory_space<smem>>
      %cst_8 = arith.constant 2.048000e+03 : f32
      %18 = arith.divf %cst_8, %17 : f32
      %c0_9 = arith.constant 0 : index
      %c0_10 = arith.constant 0 : index
      %19 = memref.load %arg2[%c0_9, %c0_10] : memref<1x1xf32, #tpu.memory_space<smem>>
      memref.store %18, %arg2[%c0_9, %c0_10] : memref<1x1xf32, #tpu.memory_space<smem>>
    } else {
    }
    return
  }
  func.func @transform_0(%arg0: i32) -> (i32, i32) {
    %c0_i32 = arith.constant 0 : i32
    %c0_i32_0 = arith.constant 0 : i32
    return %arg0, %c0_i32 : i32, i32
  }
  func.func @transform_1(%arg0: i32) -> (i32, i32) {
    %c0_i32 = arith.constant 0 : i32
    %c0_i32_0 = arith.constant 0 : i32
    %c0_i32_1 = arith.constant 0 : i32
    return %c0_i32, %c0_i32_0 : i32, i32
  }
}

</mosaic_0001>

<bundles_post_ra>
// kernel: gray_loss.1
= control target key start
LH: loop header
LB: loop body
LE: loop exit
PB: predicated region body
PF: predicated region fallthrough
CT: control target
= control target key end

     0   :  { %s116_s0 = inlined_call_operand.vmem [shape: f32[16,128], index: 0, kind: input, shape index: {}]   ;;  %s117_s1 = inlined_call_operand.hbm [shape: f32[1,1], index: 1, kind: output, shape index: {}]  }
   0x1   :  { %v16_v0 = vld [vmem:[%s116_s0] sm:$0xff]  ;;  %v17_v1 = vld [vmem:[%s116_s0 + $0x8] sm:$0xff] }
   0x2   :  { %6 = vsyncpa [#allocation4], 0  ;;  %v73_v2 = vadd.f32 -0.5, %v16_v0  ;;  %v74_v3 = vadd.f32 -0.5, %v17_v1  ;;  %s63_s12 = sshll.u32 %s117_s1, 4  ;;  %s96_s15 = smov [#allocation3]   ;;  %s64_s12 = int_to_ptr.hbm [resolvable:$true] %s63_s12 }
   0x4   :  { %v20_v4 = vand.u32 2147483647, %v73_v2  ;;  %v21_v5 = vand.u32 2147483647, %v74_v3 }
   0x6   :  { %v22_v6 = vadd.f32 %v21_v5, %v20_v4 }
   0x8   :  { %23 = vadd.xlane.f32.xlu0 %v22_v6 }
  0x7b   :  { %v24_v7 = vpop.xlane.xlu0 %23 }
  0x7c   :  { %v25_v8 = vrot.slane %v24_v7, 4 }
  0x7e   :  { %v26_v9 = vadd.f32 %v25_v8, %v24_v7 }
  0x80   :  { %v27_v10 = vrot.slane %v26_v9, 2 }
  0x82   :  { %v28_v11 = vadd.f32 %v27_v10, %v26_v9 }
  0x84   :  { %v29_v12 = vrot.slane %v28_v11, 1 }
  0x86   :  { %v30_v13 = vadd.f32 %v29_v12, %v28_v11 }
  0x88   :  { %75 = vpush %v30_v13 }
  0xb9   :  { %s76_s10 = spop %75 }
  0xba   :  { %v39_v14 = vstv %s76_s10 }
  0xbb   :  { %80 = vrcp.f32 %v39_v14  ;;  %v51_v18 = vand.u32 2147483648, %v39_v14  ;;  %v49_v20 = vand.u32 2147483647, %v39_v14  ;;  %vm45_vm1 = vweird.f32 %v39_v14 }
  0xbd   :  { %v52_v22 = vor.u32 1.1754944e-38, %v51_v18  ;;  %vm50_vm3 = vcmp.eq.f32.partialorder %v49_v20, 8.507059e+37 }
  0xc1   :  { %v81_v15 = vpop.eup %80 }
  0xc2   :  { %v41_v16 = vmul.f32 %v81_v15, %v39_v14  ;;  %vm46_vm0 = vweird.f32 %v81_v15 }
  0xc3   :  { %vm47_vm2 = vmor %vm45_vm1, %vm46_vm0 }
  0xc4   :  { %v42_v17 = vsub.f32 1.0, %v41_v16 }
  0xc6   :  { %v43_v19 = vmul.f32 %v81_v15, %v42_v17 }
  0xc8   :  { %v44_v21 = vadd.f32 %v81_v15, %v43_v19 }
  0xca   :  { %v48_v23 = vsel %vm47_vm2, %v81_v15, %v44_v21 }
  0xcb   :  { %v53_v24 = vsel %vm50_vm3, %v52_v22, %v48_v23 }
  0xcc   :  { %77 = vpush %v53_v24 }
  0xfd   :  { %s78_s13 = spop %77 }
  0xfe   :  { %s55_s14 = smul.f32 2048.0, %s78_s13 }
 0x100   :  { %57 = sst [smem:[#allocation3]] %s55_s14 }
 0x101   :  { %66 = dma.smem_to_hbm %s96_s15, 16, %s64_s12, [#allocation4]  }
 0x102   :  { %94 = dma.done.wait [#allocation4], 16  }
 0x103   :  { %95 = vsyncadd [#allocation4], 4294967280 }
 0x104   :  { %71 = sfence }
 0x105   :  { %72 = vsyncpa [#allocation4], 1 }

</bundles_post_ra>
